<compile_context>
chip_gen: v6e
topology: v6e:2x2x1
jax: 0.10.0
libtpu: 0.0.40
codegen_flags: <defaults>
</compile_context>

<pallas_src>
import functools

import jax
import jax.numpy as jnp
from jax.experimental import pallas as pl
from jax.experimental.pallas import tpu as pltpu

_LANE = 128       # vreg lane width
_SUBLANE = 8      # f32 sublane granularity


def _round_up(x, m):
    return ((x + m - 1) // m) * m


def _fused_mlp_kernel(*refs, num_layers):
    """refs = (x_ref, w1, b1, w2, b2, ..., wN, bN, o_ref).

    bf16 activations/weights feed the MXU with f32 accumulation
    (preferred_element_type); bias add, ReLU and sigmoid run in f32 on the
    VPU/EUP; the running activation is cast back to bf16 before the next dot
    to halve live vreg/VMEM footprint.  The layer loop is unrolled at trace
    time (layer count is static).
    """
    x_ref = refs[0]
    o_ref = refs[-1]
    wb = refs[1:-1]

    h = x_ref[...]                                            # bf16 (blk, in_p)
    for i in range(num_layers):
        w = wb[2 * i][...]                                    # bf16 (k_p, n_p)
        b = wb[2 * i + 1][...]                                # f32  (1,  n_p)
        acc = jnp.dot(h, w, preferred_element_type=jnp.float32)   # MXU, f32 acc
        acc = acc + b                                         # f32 bias add
        if i < num_layers - 1:
            acc = jnp.maximum(acc, 0.0)                       # ReLU (VPU, f32)
            h = acc.astype(jnp.bfloat16)                      # bf16 for next dot
        else:
            o_ref[...] = jax.nn.sigmoid(acc).astype(o_ref.dtype)  # EUP exp, f32 store


def _vmem_capacity_bytes():
    """Per-core VMEM capacity; conservative v7x value (64 MiB) as fallback."""
    try:
        return int(pltpu.get_tpu_info().vmem_capacity_bytes)
    except Exception:
        return 64 * 1024 * 1024


def _pick_batch_block(batch, per_row_bytes, resident_bytes, budget_bytes):
    """Largest batch tile that fits the VMEM budget, with >=2 grid steps when
    the batch allows it (uses v7x's second TensorCore via the 'parallel' axis)."""
    if batch <= 16:
        return _round_up(batch, _SUBLANE)   # single block == full padded batch
    gran = 16                               # bf16 sublane packing granularity
    target = _round_up(pl.cdiv(batch, 2), gran)
    blk = min(512, target)
    while blk > gran and resident_bytes + blk * per_row_bytes > budget_bytes:
        blk = max(gran, _round_up(blk // 2, gran))
    return blk


def fused_mlp_forward(params, x):
    """Single-pallas_call forward of the whole network.

    params: list of (w, b) with w: (in, out) f32, b: (1, out) f32.
    x:      (batch, input_dim) f32.   Returns (batch, output_dim) f32.
    """
    batch, in_dim = x.shape
    out_dim = params[-1][0].shape[1]
    num_layers = len(params)

    # ---- pad every layer dim up to a multiple of 128 lanes (zero padding is
    # exact: padded ReLU activations are 0, padded sigmoid columns are sliced
    # away below).  This makes all matmuls and the output store lane-dense.
    dims = [in_dim] + [w.shape[1] for w, _ in params]
    dims_p = [_round_up(d, _LANE) for d in dims]
    in_p, out_p = dims_p[0], dims_p[-1]

    # ---- weights -> bf16 (halves HBM/VMEM bytes, ~3-4x MXU throughput),
    # biases stay f32 (bias add is done in f32 inside the kernel).
    flat_wb = []
    for li, (w, b) in enumerate(params):
        kp, np_ = dims_p[li], dims_p[li + 1]
        w_p = jnp.zeros((kp, np_), jnp.bfloat16).at[: w.shape[0], : w.shape[1]].set(
            w.astype(jnp.bfloat16))
        b_p = jnp.zeros((1, np_), jnp.float32).at[:, : b.shape[1]].set(
            b.astype(jnp.float32))
        flat_wb.extend((w_p, b_p))
    # TODO(synk): for layer widths too large to keep weights fully resident,
    # add a K/N-tiled grid axis ("arbitrary") with an f32 VMEM accumulator;
    # int8 (v5e/v6e) or fp8 (v7x) weights would halve residency again.

    # ---- VMEM accounting (bytes) and generation-aware tile choice ----------
    resident = sum(int(a.size) * a.dtype.itemsize for a in flat_wb)
    max_dim = max(dims_p)
    # double-buffered bf16 x block + double-buffered f32 out block + f32 acc + bf16 h
    per_row = 2 * in_p * 2 + 2 * out_p * 4 + max_dim * (4 + 2)
    vmem_cap = _vmem_capacity_bytes()
    block_b = _pick_batch_block(batch, per_row, resident, vmem_cap // 2)

    batch_p = _round_up(batch, block_b)
    grid = (batch_p // block_b,)

    # ---- pad + cast the input ----------------------------------------------
    x_p = jnp.zeros((batch_p, in_p), jnp.bfloat16).at[:batch, :in_dim].set(
        x.astype(jnp.bfloat16))

    footprint = resident + block_b * per_row
    vmem_limit = int(min(vmem_cap, max(32 * 1024 * 1024, footprint + 8 * 1024 * 1024)))

    flops = 2 * batch_p * sum(a * b for a, b in zip(dims_p[:-1], dims_p[1:]))
    bytes_accessed = batch_p * in_p * 2 + batch_p * out_p * 4 + resident
    cost = pl.CostEstimate(flops=flops,
                           transcendentals=batch_p * out_p,
                           bytes_accessed=bytes_accessed)

    kernel = functools.partial(_fused_mlp_kernel, num_layers=num_layers)
    out_shape = jax.ShapeDtypeStruct((batch_p, out_p), jnp.float32)
    x_spec = pl.BlockSpec((block_b, in_p), lambda i: (i, 0))
    out_spec = pl.BlockSpec((block_b, out_p), lambda i: (i, 0))

    def build(single_buffer_params):
        in_specs = [x_spec]
        for a in flat_wb:
            if single_buffer_params:
                # Grid-invariant weights/biases: one VMEM buffer is enough
                # (default double-buffering just doubles weight residency).
                spec = pl.BlockSpec(a.shape, lambda i: (0, 0),
                                    pipeline_mode=pl.Buffered(1))
            else:
                spec = pl.BlockSpec(a.shape, lambda i: (0, 0))
            in_specs.append(spec)
        return pl.pallas_call(
            kernel,
            out_shape=out_shape,
            grid=grid,
            in_specs=in_specs,
            out_specs=out_spec,
            compiler_params=pltpu.CompilerParams(
                dimension_semantics=("parallel",),
                vmem_limit_bytes=vmem_limit,
            ),
            cost_estimate=cost,
        )

    try:
        out_padded = build(single_buffer_params=True)(x_p, *flat_wb)
    except Exception:
        # pipeline_mode single-buffering unavailable on this jax build;
        # fall back to default (double-buffered) specs.
        out_padded = build(single_buffer_params=False)(x_p, *flat_wb)

    return out_padded[:batch, :out_dim]


def init_network_params(key, input_dim, output_dim, hidden_layers):
    """Mimics nn.Linear default init: U(-1/sqrt(fan_in), 1/sqrt(fan_in))."""
    dims = [input_dim] + list(hidden_layers) + [output_dim]
    params = []
    for in_dim, out_dim in zip(dims[:-1], dims[1:]):
        key, kw, kb = jax.random.split(key, 3)
        bound = 1.0 / jnp.sqrt(jnp.float32(in_dim))
        # weight stored (in, out) so forward is x @ w  (== x @ W.T in torch)
        w = jax.random.uniform(kw, (in_dim, out_dim), jnp.float32, -bound, bound)
        b = jax.random.uniform(kb, (1, out_dim), jnp.float32, -bound, bound)
        params.append((w, b))
    return params


def network_forward(params, x):
    """Equivalent of Network.forward: (Linear -> ReLU)* -> Linear -> Sigmoid."""
    return fused_mlp_forward(params, x)


if __name__ == "__main__":
    key = jax.random.PRNGKey(0)

    # Small shapes consistent with the module.
    batch = 8
    input_dim = 32
    hidden_layers = [64, 32]
    output_dim = 16

    kparams, kx = jax.random.split(key)
    params = init_network_params(kparams, input_dim, output_dim, hidden_layers)
    x = jax.random.normal(kx, (batch, input_dim), jnp.float32)

    out = network_forward(params, x)
    out = jax.block_until_ready(out)

    # plain-JAX f32 reference; bf16 weights/activations => loose tolerance
    ref = x
    for i, (w, b) in enumerate(params):
        ref = ref @ w + b
        ref = jnp.maximum(ref, 0.0) if i < len(params) - 1 else jax.nn.sigmoid(ref)

    assert out.shape == (batch, output_dim)
    assert bool(jnp.allclose(out, ref, atol=3e-2, rtol=3e-2)), (
        float(jnp.max(jnp.abs(out - ref))))

    print("KERNEL_OK")
</pallas_src>

<mosaic_0001>
module attributes {stable_mosaic.version = 11 : i64} {
  func.func @_fused_mlp_kernel(%arg0: i32, %arg1: memref<8x128xbf16, #tpu.memory_space<vmem>>, %arg2: memref<128x128xbf16, #tpu.memory_space<vmem>>, %arg3: memref<1x128xf32, #tpu.memory_space<vmem>>, %arg4: memref<128x128xbf16, #tpu.memory_space<vmem>>, %arg5: memref<1x128xf32, #tpu.memory_space<vmem>>, %arg6: memref<128x128xbf16, #tpu.memory_space<vmem>>, %arg7: memref<1x128xf32, #tpu.memory_space<vmem>>, %arg8: memref<8x128xf32, #tpu.memory_space<vmem>>) attributes {dimension_semantics = [#tpu.dimension_semantics<parallel>], iteration_bounds = array<i64: 1>, scalar_prefetch = 0 : i64, scratch_operands = 0 : i64, tpu.core_type = #tpu.core_type<tc>, window_params = [{transform_indices = @transform_0, window_bounds = array<i64: 8, 128>}, {pipeline_mode = #tpu.pipeline_mode<synchronous>, transform_indices = @transform_1, window_bounds = array<i64: 128, 128>}, {pipeline_mode = #tpu.pipeline_mode<synchronous>, transform_indices = @transform_2, window_bounds = array<i64: 1, 128>}, {pipeline_mode = #tpu.pipeline_mode<synchronous>, transform_indices = @transform_3, window_bounds = array<i64: 128, 128>}, {pipeline_mode = #tpu.pipeline_mode<synchronous>, transform_indices = @transform_4, window_bounds = array<i64: 1, 128>}, {pipeline_mode = #tpu.pipeline_mode<synchronous>, transform_indices = @transform_5, window_bounds = array<i64: 128, 128>}, {pipeline_mode = #tpu.pipeline_mode<synchronous>, transform_indices = @transform_6, window_bounds = array<i64: 1, 128>}, {transform_indices = @transform_7, window_bounds = array<i64: 8, 128>}]} {
    %c0 = arith.constant 0 : index
    %c0_0 = arith.constant 0 : index
    %0 = vector.load %arg1[%c0, %c0_0] : memref<8x128xbf16, #tpu.memory_space<vmem>>, vector<8x128xbf16>
    %c0_1 = arith.constant 0 : index
    %c0_2 = arith.constant 0 : index
    %1 = vector.load %arg2[%c0_1, %c0_2] : memref<128x128xbf16, #tpu.memory_space<vmem>>, vector<128x128xbf16>
    %c0_3 = arith.constant 0 : index
    %c0_4 = arith.constant 0 : index
    %2 = vector.load %arg3[%c0_3, %c0_4] : memref<1x128xf32, #tpu.memory_space<vmem>>, vector<1x128xf32>
    %cst = arith.constant dense<0.000000e+00> : vector<8x128xf32>
    %3 = tpu.matmul %0, %1, %cst {dimension_numbers = #tpu.dot_dimension_numbers<[1], [0], [0], [1], [0, 0, 1, 1], [], []>} : vector<8x128xbf16>, vector<128x128xbf16>, vector<8x128xf32> -> vector<8x128xf32>
    %4 = vector.broadcast %2 : vector<1x128xf32> to vector<8x128xf32>
    %5 = arith.addf %3, %4 : vector<8x128xf32>
    %cst_5 = arith.constant 0.000000e+00 : f32
    %6 = vector.broadcast %cst_5 : f32 to vector<8x128xf32>
    %7 = arith.maximumf %5, %6 : vector<8x128xf32>
    %8 = arith.truncf %7 : vector<8x128xf32> to vector<8x128xbf16>
    %c0_6 = arith.constant 0 : index
    %c0_7 = arith.constant 0 : index
    %9 = vector.load %arg4[%c0_6, %c0_7] : memref<128x128xbf16, #tpu.memory_space<vmem>>, vector<128x128xbf16>
    %c0_8 = arith.constant 0 : index
    %c0_9 = arith.constant 0 : index
    %10 = vector.load %arg5[%c0_8, %c0_9] : memref<1x128xf32, #tpu.memory_space<vmem>>, vector<1x128xf32>
    %cst_10 = arith.constant dense<0.000000e+00> : vector<8x128xf32>
    %11 = tpu.matmul %8, %9, %cst_10 {dimension_numbers = #tpu.dot_dimension_numbers<[1], [0], [0], [1], [0, 0, 1, 1], [], []>} : vector<8x128xbf16>, vector<128x128xbf16>, vector<8x128xf32> -> vector<8x128xf32>
    %12 = vector.broadcast %10 : vector<1x128xf32> to vector<8x128xf32>
    %13 = arith.addf %11, %12 : vector<8x128xf32>
    %cst_11 = arith.constant 0.000000e+00 : f32
    %14 = vector.broadcast %cst_11 : f32 to vector<8x128xf32>
    %15 = arith.maximumf %13, %14 : vector<8x128xf32>
    %16 = arith.truncf %15 : vector<8x128xf32> to vector<8x128xbf16>
    %c0_12 = arith.constant 0 : index
    %c0_13 = arith.constant 0 : index
    %17 = vector.load %arg6[%c0_12, %c0_13] : memref<128x128xbf16, #tpu.memory_space<vmem>>, vector<128x128xbf16>
    %c0_14 = arith.constant 0 : index
    %c0_15 = arith.constant 0 : index
    %18 = vector.load %arg7[%c0_14, %c0_15] : memref<1x128xf32, #tpu.memory_space<vmem>>, vector<1x128xf32>
    %cst_16 = arith.constant dense<0.000000e+00> : vector<8x128xf32>
    %19 = tpu.matmul %16, %17, %cst_16 {dimension_numbers = #tpu.dot_dimension_numbers<[1], [0], [0], [1], [0, 0, 1, 1], [], []>} : vector<8x128xbf16>, vector<128x128xbf16>, vector<8x128xf32> -> vector<8x128xf32>
    %20 = vector.broadcast %18 : vector<1x128xf32> to vector<8x128xf32>
    %21 = arith.addf %19, %20 : vector<8x128xf32>
    %22 = arith.negf %21 : vector<8x128xf32>
    %23 = math.exp %22 : vector<8x128xf32>
    %cst_17 = arith.constant 1.000000e+00 : f32
    %24 = vector.broadcast %cst_17 : f32 to vector<8x128xf32>
    %25 = arith.addf %24, %23 : vector<8x128xf32>
    %26 = arith.divf %24, %25 : vector<8x128xf32>
    %c0_18 = arith.constant 0 : index
    %c0_19 = arith.constant 0 : index
    %27 = vector.load %arg8[%c0_18, %c0_19] : memref<8x128xf32, #tpu.memory_space<vmem>>, vector<8x128xf32>
    tpu.vector_store %arg8[%c0_18, %c0_19], %26 {strides = array<i32>} : memref<8x128xf32, #tpu.memory_space<vmem>>, vector<8x128xf32>,
    return
  }
  func.func @transform_0(%arg0: i32) -> (i32, i32) {
    %c0_i32 = arith.constant 0 : i32
    %c0_i32_0 = arith.constant 0 : i32
    return %arg0, %c0_i32 : i32, i32
  }
  func.func @transform_1(%arg0: i32) -> (i32, i32) {
    %c0_i32 = arith.constant 0 : i32
    %c0_i32_0 = arith.constant 0 : i32
    %c0_i32_1 = arith.constant 0 : i32
    return %c0_i32, %c0_i32_0 : i32, i32
  }
  func.func @transform_2(%arg0: i32) -> (i32, i32) {
    %c0_i32 = arith.constant 0 : i32
    %c0_i32_0 = arith.constant 0 : i32
    %c0_i32_1 = arith.constant 0 : i32
    return %c0_i32, %c0_i32_0 : i32, i32
  }
  func.func @transform_3(%arg0: i32) -> (i32, i32) {
    %c0_i32 = arith.constant 0 : i32
    %c0_i32_0 = arith.constant 0 : i32
    %c0_i32_1 = arith.constant 0 : i32
    return %c0_i32, %c0_i32_0 : i32, i32
  }
  func.func @transform_4(%arg0: i32) -> (i32, i32) {
    %c0_i32 = arith.constant 0 : i32
    %c0_i32_0 = arith.constant 0 : i32
    %c0_i32_1 = arith.constant 0 : i32
    return %c0_i32, %c0_i32_0 : i32, i32
  }
  func.func @transform_5(%arg0: i32) -> (i32, i32) {
    %c0_i32 = arith.constant 0 : i32
    %c0_i32_0 = arith.constant 0 : i32
    %c0_i32_1 = arith.constant 0 : i32
    return %c0_i32, %c0_i32_0 : i32, i32
  }
  func.func @transform_6(%arg0: i32) -> (i32, i32) {
    %c0_i32 = arith.constant 0 : i32
    %c0_i32_0 = arith.constant 0 : i32
    %c0_i32_1 = arith.constant 0 : i32
    return %c0_i32, %c0_i32_0 : i32, i32
  }
  func.func @transform_7(%arg0: i32) -> (i32, i32) {
    %c0_i32 = arith.constant 0 : i32
    %c0_i32_0 = arith.constant 0 : i32
    return %arg0, %c0_i32 : i32, i32
  }
}

module attributes {stable_mosaic.version = 11 : i64} {
  func.func @_fused_mlp_kernel(%arg0: i32, %arg1: memref<8x128xbf16, #tpu.memory_space<vmem>>, %arg2: memref<128x128xbf16, #tpu.memory_space<vmem>>, %arg3: memref<1x128xf32, #tpu.memory_space<vmem>>, %arg4: memref<128x128xbf16, #tpu.memory_space<vmem>>, %arg5: memref<1x128xf32, #tpu.memory_space<vmem>>, %arg6: memref<128x128xbf16, #tpu.memory_space<vmem>>, %arg7: memref<1x128xf32, #tpu.memory_space<vmem>>, %arg8: memref<8x128xf32, #tpu.memory_space<vmem>>) attributes {dimension_semantics = [#tpu.dimension_semantics<parallel>], iteration_bounds = array<i64: 1>, scalar_prefetch = 0 : i64, scratch_operands = 0 : i64, tpu.core_type = #tpu.core_type<tc>, window_params = [{transform_indices = @transform_0, window_bounds = array<i64: 8, 128>}, {pipeline_mode = #tpu.pipeline_mode<synchronous>, transform_indices = @transform_1, window_bounds = array<i64: 128, 128>}, {pipeline_mode = #tpu.pipeline_mode<synchronous>, transform_indices = @transform_2, window_bounds = array<i64: 1, 128>}, {pipeline_mode = #tpu.pipeline_mode<synchronous>, transform_indices = @transform_3, window_bounds = array<i64: 128, 128>}, {pipeline_mode = #tpu.pipeline_mode<synchronous>, transform_indices = @transform_4, window_bounds = array<i64: 1, 128>}, {pipeline_mode = #tpu.pipeline_mode<synchronous>, transform_indices = @transform_5, window_bounds = array<i64: 128, 128>}, {pipeline_mode = #tpu.pipeline_mode<synchronous>, transform_indices = @transform_6, window_bounds = array<i64: 1, 128>}, {transform_indices = @transform_7, window_bounds = array<i64: 8, 128>}]} {
    %c0 = arith.constant 0 : index
    %c0_0 = arith.constant 0 : index
    %0 = vector.load %arg1[%c0, %c0_0] : memref<8x128xbf16, #tpu.memory_space<vmem>>, vector<8x128xbf16>
    %c0_1 = arith.constant 0 : index
    %c0_2 = arith.constant 0 : index
    %1 = vector.load %arg2[%c0_1, %c0_2] : memref<128x128xbf16, #tpu.memory_space<vmem>>, vector<128x128xbf16>
    %c0_3 = arith.constant 0 : index
    %c0_4 = arith.constant 0 : index
    %2 = vector.load %arg3[%c0_3, %c0_4] : memref<1x128xf32, #tpu.memory_space<vmem>>, vector<1x128xf32>
    %cst = arith.constant dense<0.000000e+00> : vector<8x128xf32>
    %3 = tpu.matmul %0, %1, %cst {dimension_numbers = #tpu.dot_dimension_numbers<[1], [0], [0], [1], [0, 0, 1, 1], [], []>} : vector<8x128xbf16>, vector<128x128xbf16>, vector<8x128xf32> -> vector<8x128xf32>
    %4 = vector.broadcast %2 : vector<1x128xf32> to vector<8x128xf32>
    %5 = arith.addf %3, %4 : vector<8x128xf32>
    %cst_5 = arith.constant 0.000000e+00 : f32
    %6 = vector.broadcast %cst_5 : f32 to vector<8x128xf32>
    %7 = arith.maximumf %5, %6 : vector<8x128xf32>
    %8 = arith.truncf %7 : vector<8x128xf32> to vector<8x128xbf16>
    %c0_6 = arith.constant 0 : index
    %c0_7 = arith.constant 0 : index
    %9 = vector.load %arg4[%c0_6, %c0_7] : memref<128x128xbf16, #tpu.memory_space<vmem>>, vector<128x128xbf16>
    %c0_8 = arith.constant 0 : index
    %c0_9 = arith.constant 0 : index
    %10 = vector.load %arg5[%c0_8, %c0_9] : memref<1x128xf32, #tpu.memory_space<vmem>>, vector<1x128xf32>
    %cst_10 = arith.constant dense<0.000000e+00> : vector<8x128xf32>
    %11 = tpu.matmul %8, %9, %cst_10 {dimension_numbers = #tpu.dot_dimension_numbers<[1], [0], [0], [1], [0, 0, 1, 1], [], []>} : vector<8x128xbf16>, vector<128x128xbf16>, vector<8x128xf32> -> vector<8x128xf32>
    %12 = vector.broadcast %10 : vector<1x128xf32> to vector<8x128xf32>
    %13 = arith.addf %11, %12 : vector<8x128xf32>
    %cst_11 = arith.constant 0.000000e+00 : f32
    %14 = vector.broadcast %cst_11 : f32 to vector<8x128xf32>
    %15 = arith.maximumf %13, %14 : vector<8x128xf32>
    %16 = arith.truncf %15 : vector<8x128xf32> to vector<8x128xbf16>
    %c0_12 = arith.constant 0 : index
    %c0_13 = arith.constant 0 : index
    %17 = vector.load %arg6[%c0_12, %c0_13] : memref<128x128xbf16, #tpu.memory_space<vmem>>, vector<128x128xbf16>
    %c0_14 = arith.constant 0 : index
    %c0_15 = arith.constant 0 : index
    %18 = vector.load %arg7[%c0_14, %c0_15] : memref<1x128xf32, #tpu.memory_space<vmem>>, vector<1x128xf32>
    %cst_16 = arith.constant dense<0.000000e+00> : vector<8x128xf32>
    %19 = tpu.matmul %16, %17, %cst_16 {dimension_numbers = #tpu.dot_dimension_numbers<[1], [0], [0], [1], [0, 0, 1, 1], [], []>} : vector<8x128xbf16>, vector<128x128xbf16>, vector<8x128xf32> -> vector<8x128xf32>
    %20 = vector.broadcast %18 : vector<1x128xf32> to vector<8x128xf32>
    %21 = arith.addf %19, %20 : vector<8x128xf32>
    %22 = arith.negf %21 : vector<8x128xf32>
    %23 = math.exp %22 : vector<8x128xf32>
    %cst_17 = arith.constant 1.000000e+00 : f32
    %24 = vector.broadcast %cst_17 : f32 to vector<8x128xf32>
    %25 = arith.addf %24, %23 : vector<8x128xf32>
    %26 = arith.divf %24, %25 : vector<8x128xf32>
    %c0_18 = arith.constant 0 : index
    %c0_19 = arith.constant 0 : index
    %27 = vector.load %arg8[%c0_18, %c0_19] : memref<8x128xf32, #tpu.memory_space<vmem>>, vector<8x128xf32>
    tpu.vector_store %arg8[%c0_18, %c0_19], %26 {strides = array<i32>} : memref<8x128xf32, #tpu.memory_space<vmem>>, vector<8x128xf32>,
    return
  }
  func.func @transform_0(%arg0: i32) -> (i32, i32) {
    %c0_i32 = arith.constant 0 : i32
    %c0_i32_0 = arith.constant 0 : i32
    return %arg0, %c0_i32 : i32, i32
  }
  func.func @transform_1(%arg0: i32) -> (i32, i32) {
    %c0_i32 = arith.constant 0 : i32
    %c0_i32_0 = arith.constant 0 : i32
    %c0_i32_1 = arith.constant 0 : i32
    return %c0_i32, %c0_i32_0 : i32, i32
  }
  func.func @transform_2(%arg0: i32) -> (i32, i32) {
    %c0_i32 = arith.constant 0 : i32
    %c0_i32_0 = arith.constant 0 : i32
    %c0_i32_1 = arith.constant 0 : i32
    return %c0_i32, %c0_i32_0 : i32, i32
  }
  func.func @transform_3(%arg0: i32) -> (i32, i32) {
    %c0_i32 = arith.constant 0 : i32
    %c0_i32_0 = arith.constant 0 : i32
    %c0_i32_1 = arith.constant 0 : i32
    return %c0_i32, %c0_i32_0 : i32, i32
  }
  func.func @transform_4(%arg0: i32) -> (i32, i32) {
    %c0_i32 = arith.constant 0 : i32
    %c0_i32_0 = arith.constant 0 : i32
    %c0_i32_1 = arith.constant 0 : i32
    return %c0_i32, %c0_i32_0 : i32, i32
  }
  func.func @transform_5(%arg0: i32) -> (i32, i32) {
    %c0_i32 = arith.constant 0 : i32
    %c0_i32_0 = arith.constant 0 : i32
    %c0_i32_1 = arith.constant 0 : i32
    return %c0_i32, %c0_i32_0 : i32, i32
  }
  func.func @transform_6(%arg0: i32) -> (i32, i32) {
    %c0_i32 = arith.constant 0 : i32
    %c0_i32_0 = arith.constant 0 : i32
    %c0_i32_1 = arith.constant 0 : i32
    return %c0_i32, %c0_i32_0 : i32, i32
  }
  func.func @transform_7(%arg0: i32) -> (i32, i32) {
    %c0_i32 = arith.constant 0 : i32
    %c0_i32_0 = arith.constant 0 : i32
    return %arg0, %c0_i32 : i32, i32
  }
}

</mosaic_0001>

<bundles_post_ra>
// kernel: tpu_custom_call.1
= control target key start
LH: loop header
LB: loop body
LE: loop exit
PB: predicated region body
PF: predicated region fallthrough
CT: control target
= control target key end

     0   :  { %12 = vsyncpa [#allocation3], 0  ;;  %s815_s0 = inlined_call_operand.hbm [shape: bf16[8,128], index: 0, kind: input, shape index: {}]   ;;  %s816_s1 = inlined_call_operand.hbm [shape: bf16[128,128], index: 1, kind: input, shape index: {}]   ;;  %s817_s2 = inlined_call_operand.vmem [shape: f32[1,128], index: 2, kind: input, shape index: {}]   ;;  %s818_s3 = inlined_call_operand.hbm [shape: bf16[128,128], index: 3, kind: input, shape index: {}]   ;;  %s819_s4 = inlined_call_operand.vmem [shape: f32[1,128], index: 4, kind: input, shape index: {}]   ;;  %s820_s5 = inlined_call_operand.hbm [shape: bf16[128,128], index: 5, kind: input, shape index: {}]   ;;  %s821_s6 = inlined_call_operand.vmem [shape: f32[1,128], index: 6, kind: input, shape index: {}]   ;;  %s822_s7 = inlined_call_operand.hbm [shape: f32[8,128], index: 7, kind: output, shape index: {}]  }
   0x1   :  { %13 = vsyncpa [#allocation6], 0 }
   0x2   :  { %14 = vsyncpa [#allocation9], 0 }
   0x3   :  { %15 = vsyncpa [#allocation4], 0  ;;  %s703_s24 = smov [#allocation5]  }
   0x4   :  { %s31_s25 = sshll.u32 %s703_s24, 4  ;;  %s32_s25 = int_to_ptr.vmem [resolvable:$true] %s31_s25 }
   0x5   :  { %s603_s26 = scalar_lea.vmem %s32_s25, 1024  ;;  %p608_p1 = scmp.lt.s32.totalorder %s32_s25, %s32_s25 }
   0x6   :  { %p604_p0 = scmp.ne.s32.totalorder %s32_s25, %s603_s26  ;;  %p609_p2 = scmp.lt.s32.totalorder %s603_s26, %s603_s26 }
   0x8   :  { %p610_p3 = por %p609_p2, %p608_p1 }
   0xa   :  { %p611_p4 = pnand %p610_p3, %p604_p0 }
   0xc   :  { %614 = shalt.err (!%p611_p4)
}
   0xd   :  { %s704_s27 = smov 64   ;;  %s705_s28 = smov 4  }
   0xe   :  { %37 = dma.hbm_to_vmem [thread:$0]  %s816_s1, 1024, %s32_s25, [#allocation6], %s704_s27, %s704_s27, %s705_s28  }
   0xf   :  { %s706_s8 = smov [#allocation2]   ;;  %s707_s10 = smov [#allocation7]  }
  0x10   :  { %s22_s9 = sshll.u32 %s706_s8, 4  ;;  %s45_s11 = sshll.u32 %s707_s10, 4  ;;  %s23_s9 = int_to_ptr.vmem [resolvable:$true] %s22_s9  ;;  %s46_s11 = int_to_ptr.vmem [resolvable:$true] %s45_s11 }
  0x11   :  { %s623_s12 = scalar_lea.vmem %s23_s9, 64  ;;  %p628_p6 = scmp.lt.s32.totalorder %s23_s9, %s23_s9 }
  0x12   :  { %p624_p5 = scmp.ne.s32.totalorder %s23_s9, %s623_s12  ;;  %p629_p7 = scmp.lt.s32.totalorder %s623_s12, %s623_s12 }
  0x14   :  { %p630_p8 = por %p629_p7, %p628_p6 }
  0x16   :  { %p631_p9 = pnand %p630_p8, %p624_p5 }
  0x18   :  { %634 = shalt.err (!%p631_p9)
}
  0x19   :  { %25 = dma.hbm_to_vmem [thread:$0]  %s815_s0, 64, %s23_s9, [#allocation3]  }
  0x1a   :  { %s643_s15 = scalar_lea.vmem %s46_s11, 1024  ;;  %p648_p11 = scmp.lt.s32.totalorder %s46_s11, %s46_s11 }
  0x1b   :  { %p644_p10 = scmp.ne.s32.totalorder %s46_s11, %s643_s15  ;;  %p649_p12 = scmp.lt.s32.totalorder %s643_s15, %s643_s15 }
  0x1d   :  { %p650_p13 = por %p649_p12, %p648_p11 }
  0x1f   :  { %p651_p0 = pnand %p650_p13, %p644_p10 }
  0x21   :  { %654 = shalt.err (!%p651_p0)
}
  0x22   :  { %51 = dma.hbm_to_vmem [thread:$0]  %s818_s3, 1024, %s46_s11, [#allocation6], %s704_s27, %s704_s27, %s705_s28  }
  0x23   :  { %s708_s17 = smov [#allocation8]  }
  0x24   :  { %s59_s18 = sshll.u32 %s708_s17, 4  ;;  %s60_s18 = int_to_ptr.vmem [resolvable:$true] %s59_s18 }
  0x25   :  { %s663_s19 = scalar_lea.vmem %s60_s18, 1024  ;;  %p668_p2 = scmp.lt.s32.totalorder %s60_s18, %s60_s18 }
  0x26   :  { %p664_p1 = scmp.ne.s32.totalorder %s60_s18, %s663_s19  ;;  %p669_p3 = scmp.lt.s32.totalorder %s663_s19, %s663_s19 }
  0x28   :  { %p670_p4 = por %p669_p3, %p668_p2 }
  0x2a   :  { %p671_p5 = pnand %p670_p4, %p664_p1 }
  0x2c   :  { %674 = shalt.err (!%p671_p5)
}
  0x2d   :  { %65 = dma.hbm_to_vmem [thread:$0]  %s820_s5, 1024, %s60_s18, [#allocation9], %s704_s27, %s704_s27, %s705_s28  }
  0x2e   :  { %695 = dma.done.wait [#allocation3], 64  }
  0x2f   :  { %696 = vsyncadd [#allocation3], 4294967232 }
  0x30   :  { %697 = dma.done.wait [#allocation6], 2048  }
  0x31   :  { %698 = vsyncadd [#allocation6], 4294965248 }
  0x32   :  { %699 = dma.done.wait [#allocation9], 1024  }
  0x33   :  { %700 = vsyncadd [#allocation9], 4294966272  ;;  %v709_v0 = vmov 0.0   ;;  %vm710_vm0 = vmmov 0   ;;  %v567_v1 = vld [vmem:[#allocation5 + $0x38] sm:$0xff]   ;;  %v568_v2 = vld [vmem:[#allocation5 + $0x30] sm:$0xff]  }
  0x34   :  { %498 = vmatprep.subr.bf16.mxu0 %v709_v0  ;;  %514 = vmatprep.mubr.msk.bf16.mxu0 %vm710_vm0, %v709_v0  ;;  %v569_v3 = vld [vmem:[#allocation5 + $0x28] sm:$0xff]   ;;  %v575_v4 = vld [vmem:[#allocation7 + $0x38] sm:$0xff]   ;;  %v570_v5 = vld [vmem:[#allocation5 + $0x20] sm:$0xff]  }
  0x35   :  { %518 = vmatprep.subr.bf16.mxu1 %v709_v0  ;;  %534 = vmatprep.mubr.msk.bf16.mxu1 %vm710_vm0, %v709_v0  ;;  %v576_v6 = vld [vmem:[#allocation7 + $0x30] sm:$0xff]   ;;  %v571_v7 = vld [vmem:[#allocation5 + $0x18] sm:$0xff]   ;;  %v577_v8 = vld [vmem:[#allocation7 + $0x28] sm:$0xff]  }
  0x36   :  { %499 = vmatpush3.bf16.msra.mxu0 %v567_v1  ;;  %519 = vmatpush3.bf16.msra.mxu1 %v575_v4  ;;  %v572_v9 = vld [vmem:[#allocation5 + $0x10] sm:$0xff]   ;;  %v578_v10 = vld [vmem:[#allocation7 + $0x20] sm:$0xff]   ;;  %v573_v11 = vld [vmem:[#allocation5 + $0x8] sm:$0xff]  }
  0x37   :  { %500 = vmatprep.subr.bf16.mxu0 %v709_v0  ;;  %520 = vmatprep.subr.bf16.mxu1 %v709_v0  ;;  %v579_v12 = vld [vmem:[#allocation7 + $0x18] sm:$0xff]   ;;  %v574_v13 = vld [vmem:[#allocation5] sm:$0xff]   ;;  %v580_v14 = vld [vmem:[#allocation7 + $0x10] sm:$0xff]  }
  0x38   :  { %v81_v15 = vld [vmem:[#allocation2] sm:$0xf]  ;;  %v581_v16 = vld [vmem:[#allocation7 + $0x8] sm:$0xff]   ;;  %v582_v17 = vld [vmem:[#allocation7] sm:$0xff]  }
  0x39   :  { %v583_v18 = vld [vmem:[#allocation8 + $0x38] sm:$0xff]   ;;  %v584_v19 = vld [vmem:[#allocation8 + $0x30] sm:$0xff]   ;;  %v585_v20 = vld [vmem:[#allocation8 + $0x28] sm:$0xff]  }
  0x3a   :  { %501 = vmatpush3.bf16.msra.mxu0 %v568_v2  ;;  %521 = vmatpush3.bf16.msra.mxu1 %v576_v6  ;;  %v586_v21 = vld [vmem:[#allocation8 + $0x20] sm:$0xff]   ;;  %v587_v22 = vld [vmem:[#allocation8 + $0x18] sm:$0xff]   ;;  %v588_v23 = vld [vmem:[#allocation8 + $0x10] sm:$0xff]  }
  0x3b   :  { %502 = vmatprep.subr.bf16.mxu0 %v709_v0  ;;  %522 = vmatprep.subr.bf16.mxu1 %v709_v0  ;;  %v443_v24 = vld [vmem:[%s817_s2] ss:$0 sm:$0xff]  ;;  %v589_v32 = vld [vmem:[#allocation8 + $0x8] sm:$0xff]   ;;  %v590_v33 = vld [vmem:[#allocation8] sm:$0xff]  }
  0x3c   :  { %v452_v34 = vld [vmem:[%s819_s4] ss:$0 sm:$0xff]  ;;  %s711_s4 = smov [#allocation10]  }
  0x3d   :  { %v461_v42 = vld [vmem:[%s821_s6] ss:$0 sm:$0xff]  ;;  %s432_s24 = sshll.u32 %s711_s4, 4  ;;  %s433_s24 = int_to_ptr.vmem [resolvable:$true] %s432_s24 }
  0x3e   :  { %503 = vmatpush3.bf16.msra.mxu0 %v569_v3  ;;  %523 = vmatpush3.bf16.msra.mxu1 %v577_v8  ;;  %s675_s25 = scalar_lea.vmem %s433_s24, 128  ;;  %p680_p7 = scmp.lt.s32.totalorder %s433_s24, %s433_s24 }
  0x3f   :  { %504 = vmatprep.subr.bf16.mxu0 %v709_v0  ;;  %524 = vmatprep.subr.bf16.mxu1 %v709_v0  ;;  %p676_p6 = scmp.ne.s32.totalorder %s433_s24, %s675_s25  ;;  %p681_p8 = scmp.lt.s32.totalorder %s675_s25, %s675_s25 }
  0x41   :  { %p682_p9 = por %p681_p8, %p680_p7 }
  0x42   :  { %505 = vmatpush3.bf16.msra.mxu0 %v570_v5  ;;  %525 = vmatpush3.bf16.msra.mxu1 %v578_v10 }
  0x43   :  { %506 = vmatprep.subr.bf16.mxu0 %v709_v0  ;;  %526 = vmatprep.subr.bf16.mxu1 %v709_v0  ;;  %p683_p10 = pnand %p682_p9, %p676_p6 }
  0x46   :  { %507 = vmatpush3.bf16.msra.mxu0 %v571_v7  ;;  %527 = vmatpush3.bf16.msra.mxu1 %v579_v12 }
  0x47   :  { %508 = vmatprep.subr.bf16.mxu0 %v709_v0  ;;  %528 = vmatprep.subr.bf16.mxu1 %v709_v0 }
  0x4a   :  { %509 = vmatpush3.bf16.msra.mxu0 %v572_v9  ;;  %529 = vmatpush3.bf16.msra.mxu1 %v580_v14 }
  0x4b   :  { %510 = vmatprep.subr.bf16.mxu0 %v709_v0  ;;  %530 = vmatprep.subr.bf16.mxu1 %v709_v0 }
  0x4e   :  { %511 = vmatpush3.bf16.msra.mxu0 %v573_v11  ;;  %531 = vmatpush3.bf16.msra.mxu1 %v581_v16 }
  0x4f   :  { %512 = vmatprep.subr.bf16.mxu0 %v709_v0  ;;  %532 = vmatprep.subr.bf16.mxu1 %v709_v0 }
  0x52   :  { %513 = vmatpush3.bf16.msra.mxu0 %v574_v13  ;;  %533 = vmatpush3.bf16.msra.mxu1 %v582_v17 }
  0x53   :  { %538 = vmatprep.subr.bf16.mxu0 %v709_v0 }
  0x55   :  { %515 = vmatmul.mubr.bf16.vlgmr.msra.gmra.mxu0 %v81_v15 }
  0x56   :  { %554 = vmatprep.mubr.msk.bf16.mxu0 %vm710_vm0, %v709_v0  ;;  %539 = vmatpush3.bf16.msra.mxu0 %v583_v18 }
  0x57   :  { %540 = vmatprep.subr.bf16.mxu0 %v709_v0 }
  0x5a   :  { %541 = vmatpush3.bf16.msra.mxu0 %v584_v19 }
  0x5b   :  { %542 = vmatprep.subr.bf16.mxu0 %v709_v0 }
  0x5e   :  { %543 = vmatpush3.bf16.msra.mxu0 %v585_v20 }
  0x5f   :  { %544 = vmatprep.subr.bf16.mxu0 %v709_v0 }
  0x62   :  { %545 = vmatpush3.bf16.msra.mxu0 %v586_v21 }
  0x63   :  { %546 = vmatprep.subr.bf16.mxu0 %v709_v0 }
  0x66   :  { %547 = vmatpush3.bf16.msra.mxu0 %v587_v22 }
  0x67   :  { %548 = vmatprep.subr.bf16.mxu0 %v709_v0 }
  0x6a   :  { %549 = vmatpush3.bf16.msra.mxu0 %v588_v23 }
  0x6b   :  { %550 = vmatprep.subr.bf16.mxu0 %v709_v0 }
  0x6e   :  { %551 = vmatpush3.bf16.msra.mxu0 %v589_v32 }
  0x6f   :  { %552 = vmatprep.subr.bf16.mxu0 %v709_v0 }
  0x72   :  { %553 = vmatpush3.bf16.msra.mxu0 %v590_v33 }
 0x115   :  { %v187_v25 = vpop.f32.mrf.mxu0 }
 0x116   :  { %v188_v26 = vadd.f32 %v443_v24, %v187_v25 }
 0x117   :  { %v516_v27 = vpop.f32.mrf.mxu0 }
 0x118   :  { %v193_v28 = vmax.f32 %v188_v26, 0.0 }
 0x119   :  { %v190_v29 = vpop.f32.mrf.mxu0 }
 0x11a   :  { %v194_v30 = vpack.c.bf16 %v193_v28, %v193_v28 }
 0x11b   :  { %v517_v31 = vpop.f32.mrf.mxu0 }
 0x11c   :  { %535 = vmatmul.mubr.bf16.vlgmr.msra.gmra.mxu1 %v194_v30 }
 0x1dc   :  { %v300_v35 = vpop.f32.mrf.mxu1 }
 0x1dd   :  { %v301_v36 = vadd.f32 %v452_v34, %v300_v35 }
 0x1de   :  { %v536_v37 = vpop.f32.mrf.mxu1 }
 0x1df   :  { %v306_v38 = vmax.f32 %v301_v36, 0.0 }
 0x1e0   :  { %v303_v39 = vpop.f32.mrf.mxu1 }
 0x1e1   :  { %v307_v40 = vpack.c.bf16 %v306_v38, %v306_v38 }
 0x1e2   :  { %v537_v41 = vpop.f32.mrf.mxu1 }
 0x1e3   :  { %555 = vmatmul.mubr.bf16.vlgmr.msra.gmra.mxu0 %v307_v40 }
 0x2a3   :  { %v413_v43 = vpop.f32.mrf.mxu0 }
 0x2a4   :  { %v414_v44 = vadd.f32 %v461_v42, %v413_v43 }
 0x2a5   :  { %v556_v45 = vpop.f32.mrf.mxu0 }
 0x2a6   :  { %v470_v46 = vmul.f32 -1.442695, %v414_v44 }
 0x2a7   :  { %v416_v47 = vpop.f32.mrf.mxu0 }
 0x2a8   :  { %591 = vpow2.f32 %v470_v46 }
 0x2a9   :  { %v557_v48 = vpop.f32.mrf.mxu0 }
 0x2b5   :  { %v592_v49 = vpop.eup %591 }
 0x2b6   :  { %v422_v50 = vadd.f32 1.0, %v592_v49 }
 0x2b8   :  { %593 = vrcp.f32 %v422_v50 }
 0x2c5   :  { %v594_v51 = vpop.eup %593 }
 0x2c6   :  { %425 = vst [vmem:[#allocation10] sm:$0xff] %v594_v51 }
 0x2c7   :  { %686 = shalt.err (!%p683_p10)
}
 0x2c8   :  { %435 = dma.vmem_to_hbm [thread:$0]  %s433_s24, 128, %s822_s7, [#allocation4]  }
 0x2c9   :  { %701 = dma.done.wait [#allocation4], 128  }
 0x2ca   :  { %702 = vsyncadd [#allocation4], 4294967168 }
 0x2cb   :  { %439 = vsyncpa [#allocation3], 1 }
 0x2cc   :  { %440 = vsyncpa [#allocation6], 1 }
 0x2cd   :  { %441 = vsyncpa [#allocation9], 1 }
 0x2ce   :  { %442 = vsyncpa [#allocation4], 1 }

// kernel: tpu_custom_call.1
= control target key start
LH: loop header
LB: loop body
LE: loop exit
PB: predicated region body
PF: predicated region fallthrough
CT: control target
= control target key end

     0   :  { %12 = vsyncpa [#allocation3], 0  ;;  %s815_s0 = inlined_call_operand.hbm [shape: bf16[8,128], index: 0, kind: input, shape index: {}]   ;;  %s816_s1 = inlined_call_operand.hbm [shape: bf16[128,128], index: 1, kind: input, shape index: {}]   ;;  %s817_s2 = inlined_call_operand.vmem [shape: f32[1,128], index: 2, kind: input, shape index: {}]   ;;  %s818_s3 = inlined_call_operand.hbm [shape: bf16[128,128], index: 3, kind: input, shape index: {}]   ;;  %s819_s4 = inlined_call_operand.vmem [shape: f32[1,128], index: 4, kind: input, shape index: {}]   ;;  %s820_s5 = inlined_call_operand.hbm [shape: bf16[128,128], index: 5, kind: input, shape index: {}]   ;;  %s821_s6 = inlined_call_operand.vmem [shape: f32[1,128], index: 6, kind: input, shape index: {}]   ;;  %s822_s7 = inlined_call_operand.hbm [shape: f32[8,128], index: 7, kind: output, shape index: {}]  }
   0x1   :  { %13 = vsyncpa [#allocation6], 0 }
   0x2   :  { %14 = vsyncpa [#allocation9], 0 }
   0x3   :  { %15 = vsyncpa [#allocation4], 0  ;;  %s703_s24 = smov [#allocation5]  }
   0x4   :  { %s31_s25 = sshll.u32 %s703_s24, 4  ;;  %s32_s25 = int_to_ptr.vmem [resolvable:$true] %s31_s25 }
   0x5   :  { %s603_s26 = scalar_lea.vmem %s32_s25, 1024  ;;  %p608_p1 = scmp.lt.s32.totalorder %s32_s25, %s32_s25 }
   0x6   :  { %p604_p0 = scmp.ne.s32.totalorder %s32_s25, %s603_s26  ;;  %p609_p2 = scmp.lt.s32.totalorder %s603_s26, %s603_s26 }
   0x8   :  { %p610_p3 = por %p609_p2, %p608_p1 }
   0xa   :  { %p611_p4 = pnand %p610_p3, %p604_p0 }
   0xc   :  { %614 = shalt.err (!%p611_p4)
}
   0xd   :  { %s704_s27 = smov 64   ;;  %s705_s28 = smov 4  }
   0xe   :  { %37 = dma.hbm_to_vmem [thread:$0]  %s816_s1, 1024, %s32_s25, [#allocation6], %s704_s27, %s704_s27, %s705_s28  }
   0xf   :  { %s706_s8 = smov [#allocation2]   ;;  %s707_s10 = smov [#allocation7]  }
  0x10   :  { %s22_s9 = sshll.u32 %s706_s8, 4  ;;  %s45_s11 = sshll.u32 %s707_s10, 4  ;;  %s23_s9 = int_to_ptr.vmem [resolvable:$true] %s22_s9  ;;  %s46_s11 = int_to_ptr.vmem [resolvable:$true] %s45_s11 }
  0x11   :  { %s623_s12 = scalar_lea.vmem %s23_s9, 64  ;;  %p628_p6 = scmp.lt.s32.totalorder %s23_s9, %s23_s9 }
  0x12   :  { %p624_p5 = scmp.ne.s32.totalorder %s23_s9, %s623_s12  ;;  %p629_p7 = scmp.lt.s32.totalorder %s623_s12, %s623_s12 }
  0x14   :  { %p630_p8 = por %p629_p7, %p628_p6 }
  0x16   :  { %p631_p9 = pnand %p630_p8, %p624_p5 }
  0x18   :  { %634 = shalt.err (!%p631_p9)
}
  0x19   :  { %25 = dma.hbm_to_vmem [thread:$0]  %s815_s0, 64, %s23_s9, [#allocation3]  }
  0x1a   :  { %s643_s15 = scalar_lea.vmem %s46_s11, 1024  ;;  %p648_p11 = scmp.lt.s32.totalorder %s46_s11, %s46_s11 }
  0x1b   :  { %p644_p10 = scmp.ne.s32.totalorder %s46_s11, %s643_s15  ;;  %p649_p12 = scmp.lt.s32.totalorder %s643_s15, %s643_s15 }
  0x1d   :  { %p650_p13 = por %p649_p12, %p648_p11 }
  0x1f   :  { %p651_p0 = pnand %p650_p13, %p644_p10 }
  0x21   :  { %654 = shalt.err (!%p651_p0)
}
  0x22   :  { %51 = dma.hbm_to_vmem [thread:$0]  %s818_s3, 1024, %s46_s11, [#allocation6], %s704_s27, %s704_s27, %s705_s28  }
  0x23   :  { %s708_s17 = smov [#allocation8]  }
  0x24   :  { %s59_s18 = sshll.u32 %s708_s17, 4  ;;  %s60_s18 = int_to_ptr.vmem [resolvable:$true] %s59_s18 }
  0x25   :  { %s663_s19 = scalar_lea.vmem %s60_s18, 1024  ;;  %p668_p2 = scmp.lt.s32.totalorder %s60_s18, %s60_s18 }
  0x26   :  { %p664_p1 = scmp.ne.s32.totalorder %s60_s18, %s663_s19  ;;  %p669_p3 = scmp.lt.s32.totalorder %s663_s19, %s663_s19 }
  0x28   :  { %p670_p4 = por %p669_p3, %p668_p2 }
  0x2a   :  { %p671_p5 = pnand %p670_p4, %p664_p1 }
  0x2c   :  { %674 = shalt.err (!%p671_p5)
}
  0x2d   :  { %65 = dma.hbm_to_vmem [thread:$0]  %s820_s5, 1024, %s60_s18, [#allocation9], %s704_s27, %s704_s27, %s705_s28  }
  0x2e   :  { %695 = dma.done.wait [#allocation3], 64  }
  0x2f   :  { %696 = vsyncadd [#allocation3], 4294967232 }
  0x30   :  { %697 = dma.done.wait [#allocation6], 2048  }
  0x31   :  { %698 = vsyncadd [#allocation6], 4294965248 }
  0x32   :  { %699 = dma.done.wait [#allocation9], 1024  }
  0x33   :  { %700 = vsyncadd [#allocation9], 4294966272  ;;  %v709_v0 = vmov 0.0   ;;  %vm710_vm0 = vmmov 0   ;;  %v567_v1 = vld [vmem:[#allocation5 + $0x38] sm:$0xff]   ;;  %v568_v2 = vld [vmem:[#allocation5 + $0x30] sm:$0xff]  }
  0x34   :  { %498 = vmatprep.subr.bf16.mxu0 %v709_v0  ;;  %514 = vmatprep.mubr.msk.bf16.mxu0 %vm710_vm0, %v709_v0  ;;  %v569_v3 = vld [vmem:[#allocation5 + $0x28] sm:$0xff]   ;;  %v575_v4 = vld [vmem:[#allocation7 + $0x38] sm:$0xff]   ;;  %v570_v5 = vld [vmem:[#allocation5 + $0x20] sm:$0xff]  }
  0x35   :  { %518 = vmatprep.subr.bf16.mxu1 %v709_v0  ;;  %534 = vmatprep.mubr.msk.bf16.mxu1 %vm710_vm0, %v709_v0  ;;  %v576_v6 = vld [vmem:[#allocation7 + $0x30] sm:$0xff]   ;;  %v571_v7 = vld [vmem:[#allocation5 + $0x18] sm:$0xff]   ;;  %v577_v8 = vld [vmem:[#allocation7 + $0x28] sm:$0xff]  }
  0x36   :  { %499 = vmatpush3.bf16.msra.mxu0 %v567_v1  ;;  %519 = vmatpush3.bf16.msra.mxu1 %v575_v4  ;;  %v572_v9 = vld [vmem:[#allocation5 + $0x10] sm:$0xff]   ;;  %v578_v10 = vld [vmem:[#allocation7 + $0x20] sm:$0xff]   ;;  %v573_v11 = vld [vmem:[#allocation5 + $0x8] sm:$0xff]  }
  0x37   :  { %500 = vmatprep.subr.bf16.mxu0 %v709_v0  ;;  %520 = vmatprep.subr.bf16.mxu1 %v709_v0  ;;  %v579_v12 = vld [vmem:[#allocation7 + $0x18] sm:$0xff]   ;;  %v574_v13 = vld [vmem:[#allocation5] sm:$0xff]   ;;  %v580_v14 = vld [vmem:[#allocation7 + $0x10] sm:$0xff]  }
  0x38   :  { %v81_v15 = vld [vmem:[#allocation2] sm:$0xf]  ;;  %v581_v16 = vld [vmem:[#allocation7 + $0x8] sm:$0xff]   ;;  %v582_v17 = vld [vmem:[#allocation7] sm:$0xff]  }
  0x39   :  { %v583_v18 = vld [vmem:[#allocation8 + $0x38] sm:$0xff]   ;;  %v584_v19 = vld [vmem:[#allocation8 + $0x30] sm:$0xff]   ;;  %v585_v20 = vld [vmem:[#allocation8 + $0x28] sm:$0xff]  }
  0x3a   :  { %501 = vmatpush3.bf16.msra.mxu0 %v568_v2  ;;  %521 = vmatpush3.bf16.msra.mxu1 %v576_v6  ;;  %v586_v21 = vld [vmem:[#allocation8 + $0x20] sm:$0xff]   ;;  %v587_v22 = vld [vmem:[#allocation8 + $0x18] sm:$0xff]   ;;  %v588_v23 = vld [vmem:[#allocation8 + $0x10] sm:$0xff]  }
  0x3b   :  { %502 = vmatprep.subr.bf16.mxu0 %v709_v0  ;;  %522 = vmatprep.subr.bf16.mxu1 %v709_v0  ;;  %v443_v24 = vld [vmem:[%s817_s2] ss:$0 sm:$0xff]  ;;  %v589_v32 = vld [vmem:[#allocation8 + $0x8] sm:$0xff]   ;;  %v590_v33 = vld [vmem:[#allocation8] sm:$0xff]  }
  0x3c   :  { %v452_v34 = vld [vmem:[%s819_s4] ss:$0 sm:$0xff]  ;;  %s711_s4 = smov [#allocation10]  }
  0x3d   :  { %v461_v42 = vld [vmem:[%s821_s6] ss:$0 sm:$0xff]  ;;  %s432_s24 = sshll.u32 %s711_s4, 4  ;;  %s433_s24 = int_to_ptr.vmem [resolvable:$true] %s432_s24 }
  0x3e   :  { %503 = vmatpush3.bf16.msra.mxu0 %v569_v3  ;;  %523 = vmatpush3.bf16.msra.mxu1 %v577_v8  ;;  %s675_s25 = scalar_lea.vmem %s433_s24, 128  ;;  %p680_p7 = scmp.lt.s32.totalorder %s433_s24, %s433_s24 }
  0x3f   :  { %504 = vmatprep.subr.bf16.mxu0 %v709_v0  ;;  %524 = vmatprep.subr.bf16.mxu1 %v709_v0  ;;  %p676_p6 = scmp.ne.s32.totalorder %s433_s24, %s675_s25  ;;  %p681_p8 = scmp.lt.s32.totalorder %s675_s25, %s675_s25 }
  0x41   :  { %p682_p9 = por %p681_p8, %p680_p7 }
  0x42   :  { %505 = vmatpush3.bf16.msra.mxu0 %v570_v5  ;;  %525 = vmatpush3.bf16.msra.mxu1 %v578_v10 }
  0x43   :  { %506 = vmatprep.subr.bf16.mxu0 %v709_v0  ;;  %526 = vmatprep.subr.bf16.mxu1 %v709_v0  ;;  %p683_p10 = pnand %p682_p9, %p676_p6 }
  0x46   :  { %507 = vmatpush3.bf16.msra.mxu0 %v571_v7  ;;  %527 = vmatpush3.bf16.msra.mxu1 %v579_v12 }
  0x47   :  { %508 = vmatprep.subr.bf16.mxu0 %v709_v0  ;;  %528 = vmatprep.subr.bf16.mxu1 %v709_v0 }
  0x4a   :  { %509 = vmatpush3.bf16.msra.mxu0 %v572_v9  ;;  %529 = vmatpush3.bf16.msra.mxu1 %v580_v14 }
  0x4b   :  { %510 = vmatprep.subr.bf16.mxu0 %v709_v0  ;;  %530 = vmatprep.subr.bf16.mxu1 %v709_v0 }
  0x4e   :  { %511 = vmatpush3.bf16.msra.mxu0 %v573_v11  ;;  %531 = vmatpush3.bf16.msra.mxu1 %v581_v16 }
  0x4f   :  { %512 = vmatprep.subr.bf16.mxu0 %v709_v0  ;;  %532 = vmatprep.subr.bf16.mxu1 %v709_v0 }
  0x52   :  { %513 = vmatpush3.bf16.msra.mxu0 %v574_v13  ;;  %533 = vmatpush3.bf16.msra.mxu1 %v582_v17 }
  0x53   :  { %538 = vmatprep.subr.bf16.mxu0 %v709_v0 }
  0x55   :  { %515 = vmatmul.mubr.bf16.vlgmr.msra.gmra.mxu0 %v81_v15 }
  0x56   :  { %554 = vmatprep.mubr.msk.bf16.mxu0 %vm710_vm0, %v709_v0  ;;  %539 = vmatpush3.bf16.msra.mxu0 %v583_v18 }
  0x57   :  { %540 = vmatprep.subr.bf16.mxu0 %v709_v0 }
  0x5a   :  { %541 = vmatpush3.bf16.msra.mxu0 %v584_v19 }
  0x5b   :  { %542 = vmatprep.subr.bf16.mxu0 %v709_v0 }
  0x5e   :  { %543 = vmatpush3.bf16.msra.mxu0 %v585_v20 }
  0x5f   :  { %544 = vmatprep.subr.bf16.mxu0 %v709_v0 }
  0x62   :  { %545 = vmatpush3.bf16.msra.mxu0 %v586_v21 }
  0x63   :  { %546 = vmatprep.subr.bf16.mxu0 %v709_v0 }
  0x66   :  { %547 = vmatpush3.bf16.msra.mxu0 %v587_v22 }
  0x67   :  { %548 = vmatprep.subr.bf16.mxu0 %v709_v0 }
  0x6a   :  { %549 = vmatpush3.bf16.msra.mxu0 %v588_v23 }
  0x6b   :  { %550 = vmatprep.subr.bf16.mxu0 %v709_v0 }
  0x6e   :  { %551 = vmatpush3.bf16.msra.mxu0 %v589_v32 }
  0x6f   :  { %552 = vmatprep.subr.bf16.mxu0 %v709_v0 }
  0x72   :  { %553 = vmatpush3.bf16.msra.mxu0 %v590_v33 }
 0x115   :  { %v187_v25 = vpop.f32.mrf.mxu0 }
 0x116   :  { %v188_v26 = vadd.f32 %v443_v24, %v187_v25 }
 0x117   :  { %v516_v27 = vpop.f32.mrf.mxu0 }
 0x118   :  { %v193_v28 = vmax.f32 %v188_v26, 0.0 }
 0x119   :  { %v190_v29 = vpop.f32.mrf.mxu0 }
 0x11a   :  { %v194_v30 = vpack.c.bf16 %v193_v28, %v193_v28 }
 0x11b   :  { %v517_v31 = vpop.f32.mrf.mxu0 }
 0x11c   :  { %535 = vmatmul.mubr.bf16.vlgmr.msra.gmra.mxu1 %v194_v30 }
 0x1dc   :  { %v300_v35 = vpop.f32.mrf.mxu1 }
 0x1dd   :  { %v301_v36 = vadd.f32 %v452_v34, %v300_v35 }
 0x1de   :  { %v536_v37 = vpop.f32.mrf.mxu1 }
 0x1df   :  { %v306_v38 = vmax.f32 %v301_v36, 0.0 }
 0x1e0   :  { %v303_v39 = vpop.f32.mrf.mxu1 }
 0x1e1   :  { %v307_v40 = vpack.c.bf16 %v306_v38, %v306_v38 }
 0x1e2   :  { %v537_v41 = vpop.f32.mrf.mxu1 }
 0x1e3   :  { %555 = vmatmul.mubr.bf16.vlgmr.msra.gmra.mxu0 %v307_v40 }
 0x2a3   :  { %v413_v43 = vpop.f32.mrf.mxu0 }
 0x2a4   :  { %v414_v44 = vadd.f32 %v461_v42, %v413_v43 }
 0x2a5   :  { %v556_v45 = vpop.f32.mrf.mxu0 }
 0x2a6   :  { %v470_v46 = vmul.f32 -1.442695, %v414_v44 }
 0x2a7   :  { %v416_v47 = vpop.f32.mrf.mxu0 }
 0x2a8   :  { %591 = vpow2.f32 %v470_v46 }
 0x2a9   :  { %v557_v48 = vpop.f32.mrf.mxu0 }
 0x2b5   :  { %v592_v49 = vpop.eup %591 }
 0x2b6   :  { %v422_v50 = vadd.f32 1.0, %v592_v49 }
 0x2b8   :  { %593 = vrcp.f32 %v422_v50 }
 0x2c5   :  { %v594_v51 = vpop.eup %593 }
 0x2c6   :  { %425 = vst [vmem:[#allocation10] sm:$0xff] %v594_v51 }
 0x2c7   :  { %686 = shalt.err (!%p683_p10)
}
 0x2c8   :  { %435 = dma.vmem_to_hbm [thread:$0]  %s433_s24, 128, %s822_s7, [#allocation4]  }
 0x2c9   :  { %701 = dma.done.wait [#allocation4], 128  }
 0x2ca   :  { %702 = vsyncadd [#allocation4], 4294967168 }
 0x2cb   :  { %439 = vsyncpa [#allocation3], 1 }
 0x2cc   :  { %440 = vsyncpa [#allocation6], 1 }
 0x2cd   :  { %441 = vsyncpa [#allocation9], 1 }
 0x2ce   :  { %442 = vsyncpa [#allocation4], 1 }

</bundles_post_ra>
